<compile_context>
chip_gen: v5e
topology: v5e:2x2
jax: 0.10.0
libtpu: 0.0.40
codegen_flags: <defaults>
</compile_context>

<pallas_src>
import jax
import jax.numpy as jnp
from jax.experimental import pallas as pl
from jax.experimental.pallas import tpu as pltpu

# ---- problem sizes (small, consistent with the module) ----
B = 2            # batch
LQ = 8           # tgt sequence length
LK = 16          # memory sequence length
D_MODEL = 32
NHEAD = 4
HEAD_DIM = D_MODEL // NHEAD
DIM_FF = 64
EPS = 1e-5       # nn.LayerNorm default eps

NQ = B * LQ               # 16  fused query rows
NK = B * LK               # 32  fused key/value rows
NHK = NHEAD * NK          # 128 lane-stacked (head, key) axis

# ---- packed parameter/constant slab layout (f32, lane width 128) ----
ROW_WQ, ROW_WK, ROW_WV, ROW_WO = 0, 32, 64, 96           # (32,32) each, pre-transposed
ROW_W1 = 128                                             # (32,64) linear1^T
ROW_W2 = 160                                             # (64,32) linear2^T  (rows 160..223)
ROW_BQ, ROW_BK, ROW_BV, ROW_BO = 224, 225, 226, 227      # bias rows
ROW_B1, ROW_B2 = 228, 229
ROW_LN2W, ROW_LN2B, ROW_LN3W, ROW_LN3B = 230, 231, 232, 233
ROW_BMASK = 240                                          # (NQ, NHK)  additive batch mask
ROW_HMASK = 256                                          # (NHK, D)   0/1 head block-diag mask
SLAB_ROWS = 384                                          # multiple of 8
SLAB_LANES = 128


def _layer_norm(x, w, b):
    mu = jnp.mean(x, axis=-1, keepdims=True)
    xc = x - mu
    var = jnp.mean(xc * xc, axis=-1, keepdims=True)
    return xc * jax.lax.rsqrt(var + EPS) * w + b


def decoder_layer_kernel(acts_ref, slab_ref, o_ref):
    f32 = jnp.float32
    D = D_MODEL

    # Row-stacked activations: [tgt; query_pos; memory; pos]  -> (96, 32)
    tgt = acts_ref[0:NQ, :]
    qpos = acts_ref[NQ:2 * NQ, :]
    mem = acts_ref[2 * NQ:2 * NQ + NK, :]
    pos = acts_ref[2 * NQ + NK:2 * NQ + 2 * NK, :]

    # Static views into the packed slab (weights already transposed at init; zero-cost).
    wq_t = slab_ref[ROW_WQ:ROW_WQ + D, 0:D]
    wk_t = slab_ref[ROW_WK:ROW_WK + D, 0:D]
    wv_t = slab_ref[ROW_WV:ROW_WV + D, 0:D]
    wo_t = slab_ref[ROW_WO:ROW_WO + D, 0:D]
    w1_t = slab_ref[ROW_W1:ROW_W1 + D, 0:DIM_FF]
    w2_t = slab_ref[ROW_W2:ROW_W2 + DIM_FF, 0:D]
    bq = slab_ref[ROW_BQ:ROW_BQ + 1, 0:D]
    bk = slab_ref[ROW_BK:ROW_BK + 1, 0:D]
    bv = slab_ref[ROW_BV:ROW_BV + 1, 0:D]
    bo = slab_ref[ROW_BO:ROW_BO + 1, 0:D]
    b1 = slab_ref[ROW_B1:ROW_B1 + 1, 0:DIM_FF]
    b2 = slab_ref[ROW_B2:ROW_B2 + 1, 0:D]
    ln2_w = slab_ref[ROW_LN2W:ROW_LN2W + 1, 0:D]
    ln2_b = slab_ref[ROW_LN2B:ROW_LN2B + 1, 0:D]
    ln3_w = slab_ref[ROW_LN3W:ROW_LN3W + 1, 0:D]
    ln3_b = slab_ref[ROW_LN3B:ROW_LN3B + 1, 0:D]
    bmask = slab_ref[ROW_BMASK:ROW_BMASK + NQ, 0:NHK]      # (16,128), 0 / -1e30
    hmask = slab_ref[ROW_HMASK:ROW_HMASK + NHK, 0:D]       # (128,32), 0/1 block-diag

    # with_pos_embed
    q_in = tgt + qpos
    k_in = mem + pos

    # Fused-batch q/k/v projections (value = memory, no pos embed).
    q = jnp.dot(q_in, wq_t, preferred_element_type=f32) + bq     # (16,32)
    k = jnp.dot(k_in, wk_t, preferred_element_type=f32) + bk     # (32,32)
    v = jnp.dot(mem, wv_t, preferred_element_type=f32) + bv      # (32,32)

    # Sublane-stack K/V 4x and mask to per-head block diagonals:
    # row 32h+j carries only head h's feature columns of key/value j.
    k_bd = jnp.concatenate([k, k, k, k], axis=0) * hmask         # (128,32)
    v_bd = jnp.concatenate([v, v, v, v], axis=0) * hmask         # (128,32)

    # All-head scores in one lane-dense (16,128) tile: lane 32h+j == (head h, key j).
    # Contracting dims ((1,),(1,)) == Q @ K^T form (no materialized transpose).
    s = jax.lax.dot_general(q, k_bd, (((1,), (1,)), ((), ())),
                            preferred_element_type=f32)
    s = s * (1.0 / (HEAD_DIM ** 0.5)) + bmask          # additive cross-batch mask
    s = s - jnp.max(s, axis=-1, keepdims=True)         # shared row max (exact per head)
    p = jnp.exp(s)                                     # masked lanes underflow to 0

    # Per-head softmax denominators broadcast to their head's feature columns,
    # via one matmul against the 0/1 head mask; then P.V and out_proj.
    denom = jnp.dot(p, hmask, preferred_element_type=f32)        # (16,32)
    o_heads = jnp.dot(p, v_bd, preferred_element_type=f32)       # (16,32) concat heads
    o_heads = o_heads * pl.reciprocal(denom, approx=True)        # EUP slot
    attn = jnp.dot(o_heads, wo_t, preferred_element_type=f32) + bo

    # tgt = norm2(tgt + dropout2(attn))    (dropout == identity at inference)
    x = _layer_norm(tgt + attn, ln2_w, ln2_b)

    # FFN: linear2(dropout(relu(linear1(x))))
    h1 = jnp.maximum(jnp.dot(x, w1_t, preferred_element_type=f32) + b1, 0.0)
    h2 = jnp.dot(h1, w2_t, preferred_element_type=f32) + b2

    # tgt = norm3(x + dropout3(h2))
    o_ref[...] = _layer_norm(x + h2, ln3_w, ln3_b).astype(o_ref.dtype)


def pack_params(params):
    """Build the (384,128) parameter/constant slab ONCE at init (hoisted out of the
    per-call path).  Weights are pre-transposed; the cross-batch attention mask and the
    per-head block-diagonal 0/1 mask are baked in as constants."""
    def put(slab, row, mat):
        return jax.lax.dynamic_update_slice(slab, jnp.asarray(mat, jnp.float32), (row, 0))

    slab = jnp.zeros((SLAB_ROWS, SLAB_LANES), jnp.float32)
    wq, wk, wv = jnp.split(params["in_proj_w"], 3, axis=0)
    bq, bk, bv = jnp.split(params["in_proj_b"], 3)
    slab = put(slab, ROW_WQ, wq.T)
    slab = put(slab, ROW_WK, wk.T)
    slab = put(slab, ROW_WV, wv.T)
    slab = put(slab, ROW_WO, params["out_proj_w"].T)
    slab = put(slab, ROW_W1, params["w1"].T)
    slab = put(slab, ROW_W2, params["w2"].T)
    for row, vec in ((ROW_BQ, bq), (ROW_BK, bk), (ROW_BV, bv),
                     (ROW_BO, params["out_proj_b"]), (ROW_B1, params["b1"]),
                     (ROW_B2, params["b2"]), (ROW_LN2W, params["ln2_w"]),
                     (ROW_LN2B, params["ln2_b"]), (ROW_LN3W, params["ln3_w"]),
                     (ROW_LN3B, params["ln3_b"])):
        slab = put(slab, row, vec.reshape(1, -1))

    # Additive cross-batch mask for the (query, head*key) score tile.
    q_batch = jnp.arange(NQ)[:, None] // LQ
    k_batch = (jnp.arange(NHK)[None, :] % NK) // LK
    bmask = jnp.where(q_batch == k_batch, 0.0, -1e30).astype(jnp.float32)
    slab = put(slab, ROW_BMASK, bmask)

    # 0/1 block-diagonal head mask: row 32h+j -> feature columns [8h, 8h+8).
    # Doubles as the per-head softmax-denominator summation matrix.
    h_row = jnp.arange(NHK)[:, None] // NK
    h_col = jnp.arange(D_MODEL)[None, :] // HEAD_DIM
    hmask = (h_row == h_col).astype(jnp.float32)
    slab = put(slab, ROW_HMASK, hmask)
    return slab


_VMEM = pltpu.MemorySpace.VMEM

_COST = pl.CostEstimate(
    flops=2 * (NQ * D_MODEL * D_MODEL          # q projection
               + 2 * NK * D_MODEL * D_MODEL    # k, v projections
               + NQ * NHK * D_MODEL            # scores
               + 2 * NQ * D_MODEL * NHK        # denom + P.V
               + NQ * D_MODEL * D_MODEL        # out_proj
               + NQ * DIM_FF * D_MODEL         # linear1
               + NQ * D_MODEL * DIM_FF),       # linear2
    transcendentals=NQ * NHK + NQ * D_MODEL + 2 * NQ,   # exp + reciprocal + rsqrt
    bytes_accessed=4 * ((2 * NQ + 2 * NK) * D_MODEL + SLAB_ROWS * SLAB_LANES
                        + NQ * D_MODEL),
)


@jax.jit
def transformer_decoder_layer(tgt, memory, query_pos, pos, slab):
    """tgt/query_pos: (B,LQ,D); memory/pos: (B,LK,D); slab: precomputed by pack_params."""
    # Row-stack all four activations -> a single activation DMA into the kernel.
    acts = jnp.concatenate(
        [tgt.reshape(NQ, D_MODEL), query_pos.reshape(NQ, D_MODEL),
         memory.reshape(NK, D_MODEL), pos.reshape(NK, D_MODEL)], axis=0)
    out2d = pl.pallas_call(
        decoder_layer_kernel,
        out_shape=jax.ShapeDtypeStruct((NQ, D_MODEL), jnp.float32),
        in_specs=[pl.BlockSpec(memory_space=_VMEM),
                  pl.BlockSpec(memory_space=_VMEM)],
        out_specs=pl.BlockSpec(memory_space=_VMEM),
        cost_estimate=_COST,
    )(acts, slab)
    return out2d.reshape(B, LQ, D_MODEL)


def reference_decoder_layer(tgt, memory, query_pos, pos, params):
    """Pure-JAX reference matching forward_post (use_self_attn=False, eval mode)."""
    def ln(x, w, b):
        mu = jnp.mean(x, axis=-1, keepdims=True)
        var = jnp.mean((x - mu) ** 2, axis=-1, keepdims=True)
        return (x - mu) / jnp.sqrt(var + EPS) * w + b

    q_in = tgt + query_pos
    k_in = memory + pos
    v_in = memory
    wq, wk, wv = jnp.split(params["in_proj_w"], 3, axis=0)
    bq, bk, bv = jnp.split(params["in_proj_b"], 3, axis=0)
    q = q_in @ wq.T + bq
    k = k_in @ wk.T + bk
    v = v_in @ wv.T + bv

    def heads(x, L):
        return x.reshape(B, L, NHEAD, HEAD_DIM).transpose(0, 2, 1, 3)

    qh, kh, vh = heads(q, LQ), heads(k, LK), heads(v, LK)
    s = jnp.einsum("bhqd,bhkd->bhqk", qh, kh) / (HEAD_DIM ** 0.5)
    p = jax.nn.softmax(s, axis=-1)
    o = jnp.einsum("bhqk,bhkd->bhqd", p, vh).transpose(0, 2, 1, 3).reshape(B, LQ, D_MODEL)
    attn = o @ params["out_proj_w"].T + params["out_proj_b"]

    x = ln(tgt + attn, params["ln2_w"], params["ln2_b"])
    h = jnp.maximum(x @ params["w1"].T + params["b1"], 0.0)
    h = h @ params["w2"].T + params["b2"]
    return ln(x + h, params["ln3_w"], params["ln3_b"])


if __name__ == "__main__":
    key = jax.random.PRNGKey(0)
    ks = jax.random.split(key, 12)

    tgt = jax.random.normal(ks[0], (B, LQ, D_MODEL), jnp.float32)
    memory = jax.random.normal(ks[1], (B, LK, D_MODEL), jnp.float32)
    query_pos = jax.random.normal(ks[2], (B, LQ, D_MODEL), jnp.float32)
    pos = jax.random.normal(ks[3], (B, LK, D_MODEL), jnp.float32)

    sc = 0.1
    params = {
        "in_proj_w": sc * jax.random.normal(ks[4], (3 * D_MODEL, D_MODEL), jnp.float32),
        "in_proj_b": sc * jax.random.normal(ks[5], (3 * D_MODEL,), jnp.float32),
        "out_proj_w": sc * jax.random.normal(ks[6], (D_MODEL, D_MODEL), jnp.float32),
        "out_proj_b": sc * jax.random.normal(ks[7], (D_MODEL,), jnp.float32),
        "w1": sc * jax.random.normal(ks[8], (DIM_FF, D_MODEL), jnp.float32),
        "b1": sc * jax.random.normal(ks[9], (DIM_FF,), jnp.float32),
        "w2": sc * jax.random.normal(ks[10], (D_MODEL, DIM_FF), jnp.float32),
        "b2": sc * jax.random.normal(ks[11], (D_MODEL,), jnp.float32),
        # LayerNorm defaults: weight=1, bias=0 (like nn.LayerNorm init)
        "ln2_w": jnp.ones((D_MODEL,), jnp.float32),
        "ln2_b": jnp.zeros((D_MODEL,), jnp.float32),
        "ln3_w": jnp.ones((D_MODEL,), jnp.float32),
        "ln3_b": jnp.zeros((D_MODEL,), jnp.float32),
    }

    # Slab built ONCE at init; never re-packed in the per-call path.
    slab = jax.block_until_ready(pack_params(params))

    out = transformer_decoder_layer(tgt, memory, query_pos, pos, slab)
    out = jax.block_until_ready(out)

    ref = reference_decoder_layer(tgt, memory, query_pos, pos, params)
    assert out.shape == (B, LQ, D_MODEL)
    # Tolerance covers the approx (EUP) reciprocal in the softmax normalization.
    assert jnp.allclose(out, ref, atol=2e-3, rtol=2e-3), \
        f"max abs err {jnp.max(jnp.abs(out - ref))}"

    print("KERNEL_OK")
</pallas_src>

<mosaic_0001>
module attributes {stable_mosaic.version = 11 : i64} {
  func.func @decoder_layer_kernel(%arg0: memref<96x32xf32, #tpu.memory_space<vmem>>, %arg1: memref<384x128xf32, #tpu.memory_space<vmem>>, %arg2: memref<16x32xf32, #tpu.memory_space<vmem>>) attributes {dimension_semantics = [], scalar_prefetch = 0 : i64, scratch_operands = 0 : i64, tpu.core_type = #tpu.core_type<tc>} {
    %c0 = arith.constant 0 : index
    %c0_0 = arith.constant 0 : index
    %0 = vector.load %arg0[%c0, %c0_0] : memref<96x32xf32, #tpu.memory_space<vmem>>, vector<16x32xf32>
    %c16 = arith.constant 16 : index
    %c0_1 = arith.constant 0 : index
    %1 = vector.load %arg0[%c16, %c0_1] : memref<96x32xf32, #tpu.memory_space<vmem>>, vector<16x32xf32>
    %c32 = arith.constant 32 : index
    %c0_2 = arith.constant 0 : index
    %2 = vector.load %arg0[%c32, %c0_2] : memref<96x32xf32, #tpu.memory_space<vmem>>, vector<32x32xf32>
    %c64 = arith.constant 64 : index
    %c0_3 = arith.constant 0 : index
    %3 = vector.load %arg0[%c64, %c0_3] : memref<96x32xf32, #tpu.memory_space<vmem>>, vector<32x32xf32>
    %c0_4 = arith.constant 0 : index
    %c0_5 = arith.constant 0 : index
    %4 = vector.load %arg1[%c0_4, %c0_5] : memref<384x128xf32, #tpu.memory_space<vmem>>, vector<32x32xf32>
    %c32_6 = arith.constant 32 : index
    %c0_7 = arith.constant 0 : index
    %5 = vector.load %arg1[%c32_6, %c0_7] : memref<384x128xf32, #tpu.memory_space<vmem>>, vector<32x32xf32>
    %c64_8 = arith.constant 64 : index
    %c0_9 = arith.constant 0 : index
    %6 = vector.load %arg1[%c64_8, %c0_9] : memref<384x128xf32, #tpu.memory_space<vmem>>, vector<32x32xf32>
    %c96 = arith.constant 96 : index
    %c0_10 = arith.constant 0 : index
    %7 = vector.load %arg1[%c96, %c0_10] : memref<384x128xf32, #tpu.memory_space<vmem>>, vector<32x32xf32>
    %c128 = arith.constant 128 : index
    %c0_11 = arith.constant 0 : index
    %8 = vector.load %arg1[%c128, %c0_11] : memref<384x128xf32, #tpu.memory_space<vmem>>, vector<32x64xf32>
    %c160 = arith.constant 160 : index
    %c0_12 = arith.constant 0 : index
    %9 = vector.load %arg1[%c160, %c0_12] : memref<384x128xf32, #tpu.memory_space<vmem>>, vector<64x32xf32>
    %c224 = arith.constant 224 : index
    %c0_13 = arith.constant 0 : index
    %10 = vector.load %arg1[%c224, %c0_13] : memref<384x128xf32, #tpu.memory_space<vmem>>, vector<1x32xf32>
    %c225 = arith.constant 225 : index
    %c0_14 = arith.constant 0 : index
    %11 = vector.load %arg1[%c225, %c0_14] : memref<384x128xf32, #tpu.memory_space<vmem>>, vector<1x32xf32>
    %c226 = arith.constant 226 : index
    %c0_15 = arith.constant 0 : index
    %12 = vector.load %arg1[%c226, %c0_15] : memref<384x128xf32, #tpu.memory_space<vmem>>, vector<1x32xf32>
    %c227 = arith.constant 227 : index
    %c0_16 = arith.constant 0 : index
    %13 = vector.load %arg1[%c227, %c0_16] : memref<384x128xf32, #tpu.memory_space<vmem>>, vector<1x32xf32>
    %c228 = arith.constant 228 : index
    %c0_17 = arith.constant 0 : index
    %14 = vector.load %arg1[%c228, %c0_17] : memref<384x128xf32, #tpu.memory_space<vmem>>, vector<1x64xf32>
    %c229 = arith.constant 229 : index
    %c0_18 = arith.constant 0 : index
    %15 = vector.load %arg1[%c229, %c0_18] : memref<384x128xf32, #tpu.memory_space<vmem>>, vector<1x32xf32>
    %c230 = arith.constant 230 : index
    %c0_19 = arith.constant 0 : index
    %16 = vector.load %arg1[%c230, %c0_19] : memref<384x128xf32, #tpu.memory_space<vmem>>, vector<1x32xf32>
    %c231 = arith.constant 231 : index
    %c0_20 = arith.constant 0 : index
    %17 = vector.load %arg1[%c231, %c0_20] : memref<384x128xf32, #tpu.memory_space<vmem>>, vector<1x32xf32>
    %c232 = arith.constant 232 : index
    %c0_21 = arith.constant 0 : index
    %18 = vector.load %arg1[%c232, %c0_21] : memref<384x128xf32, #tpu.memory_space<vmem>>, vector<1x32xf32>
    %c233 = arith.constant 233 : index
    %c0_22 = arith.constant 0 : index
    %19 = vector.load %arg1[%c233, %c0_22] : memref<384x128xf32, #tpu.memory_space<vmem>>, vector<1x32xf32>
    %c240 = arith.constant 240 : index
    %c0_23 = arith.constant 0 : index
    %20 = vector.load %arg1[%c240, %c0_23] : memref<384x128xf32, #tpu.memory_space<vmem>>, vector<16x128xf32>
    %c256 = arith.constant 256 : index
    %c0_24 = arith.constant 0 : index
    %21 = vector.load %arg1[%c256, %c0_24] : memref<384x128xf32, #tpu.memory_space<vmem>>, vector<128x32xf32>
    %22 = arith.addf %0, %1 : vector<16x32xf32>
    %23 = arith.addf %2, %3 : vector<32x32xf32>
    %cst = arith.constant dense<0.000000e+00> : vector<16x32xf32>
    %24 = tpu.matmul %22, %4, %cst {dimension_numbers = #tpu.dot_dimension_numbers<[1], [0], [0], [1], [0, 0, 1, 1], [], []>} : vector<16x32xf32>, vector<32x32xf32>, vector<16x32xf32> -> vector<16x32xf32>
    %25 = vector.broadcast %10 : vector<1x32xf32> to vector<16x32xf32>
    %26 = arith.addf %24, %25 : vector<16x32xf32>
    %cst_25 = arith.constant dense<0.000000e+00> : vector<32x32xf32>
    %27 = tpu.matmul %23, %5, %cst_25 {dimension_numbers = #tpu.dot_dimension_numbers<[1], [0], [0], [1], [0, 0, 1, 1], [], []>} : vector<32x32xf32>, vector<32x32xf32>, vector<32x32xf32> -> vector<32x32xf32>
    %28 = vector.broadcast %11 : vector<1x32xf32> to vector<32x32xf32>
    %29 = arith.addf %27, %28 : vector<32x32xf32>
    %cst_26 = arith.constant dense<0.000000e+00> : vector<32x32xf32>
    %30 = tpu.matmul %2, %6, %cst_26 {dimension_numbers = #tpu.dot_dimension_numbers<[1], [0], [0], [1], [0, 0, 1, 1], [], []>} : vector<32x32xf32>, vector<32x32xf32>, vector<32x32xf32> -> vector<32x32xf32>
    %31 = vector.broadcast %12 : vector<1x32xf32> to vector<32x32xf32>
    %32 = arith.addf %30, %31 : vector<32x32xf32>
    %33 = tpu.concatenate %29, %29, %29, %29 in 0 : vector<32x32xf32>, vector<32x32xf32>, vector<32x32xf32>, vector<32x32xf32> -> vector<128x32xf32>
    %34 = arith.mulf %33, %21 : vector<128x32xf32>
    %35 = tpu.concatenate %32, %32, %32, %32 in 0 : vector<32x32xf32>, vector<32x32xf32>, vector<32x32xf32>, vector<32x32xf32> -> vector<128x32xf32>
    %36 = arith.mulf %35, %21 : vector<128x32xf32>
    %cst_27 = arith.constant dense<0.000000e+00> : vector<16x128xf32>
    %37 = tpu.matmul %26, %34, %cst_27 {dimension_numbers = #tpu.dot_dimension_numbers<[1], [1], [0], [0], [0, 0, 1, 0], [], []>} : vector<16x32xf32>, vector<128x32xf32>, vector<16x128xf32> -> vector<16x128xf32>
    %cst_28 = arith.constant 0.353553385 : f32
    %38 = vector.broadcast %cst_28 : f32 to vector<16x128xf32>
    %39 = arith.mulf %37, %38 : vector<16x128xf32>
    %40 = arith.addf %39, %20 : vector<16x128xf32>
    %cst_29 = arith.constant dense<0xFF800000> : vector<16xf32>
    %41 = vector.multi_reduction <maximumf>, %40, %cst_29 [1] : vector<16x128xf32> to vector<16xf32>
    %42 = vector.shape_cast %41 : vector<16xf32> to vector<16x1xf32>
    %43 = vector.broadcast %42 : vector<16x1xf32> to vector<16x128xf32>
    %44 = arith.subf %40, %43 : vector<16x128xf32>
    %45 = math.exp %44 : vector<16x128xf32>
    %cst_30 = arith.constant dense<0.000000e+00> : vector<16x32xf32>
    %46 = tpu.matmul %45, %21, %cst_30 {dimension_numbers = #tpu.dot_dimension_numbers<[1], [0], [0], [1], [0, 0, 1, 1], [], []>} : vector<16x128xf32>, vector<128x32xf32>, vector<16x32xf32> -> vector<16x32xf32>
    %cst_31 = arith.constant dense<0.000000e+00> : vector<16x32xf32>
    %47 = tpu.matmul %45, %36, %cst_31 {dimension_numbers = #tpu.dot_dimension_numbers<[1], [0], [0], [1], [0, 0, 1, 1], [], []>} : vector<16x128xf32>, vector<128x32xf32>, vector<16x32xf32> -> vector<16x32xf32>
    %48 = tpu.reciprocal %46 {approx = true} : vector<16x32xf32> -> vector<16x32xf32>
    %49 = arith.mulf %47, %48 : vector<16x32xf32>
    %cst_32 = arith.constant dense<0.000000e+00> : vector<16x32xf32>
    %50 = tpu.matmul %49, %7, %cst_32 {dimension_numbers = #tpu.dot_dimension_numbers<[1], [0], [0], [1], [0, 0, 1, 1], [], []>} : vector<16x32xf32>, vector<32x32xf32>, vector<16x32xf32> -> vector<16x32xf32>
    %51 = vector.broadcast %13 : vector<1x32xf32> to vector<16x32xf32>
    %52 = arith.addf %50, %51 : vector<16x32xf32>
    %53 = arith.addf %0, %52 : vector<16x32xf32>
    %cst_33 = arith.constant dense<0.000000e+00> : vector<16xf32>
    %54 = vector.multi_reduction <add>, %53, %cst_33 [1] : vector<16x32xf32> to vector<16xf32>
    %55 = vector.shape_cast %54 : vector<16xf32> to vector<16x1xf32>
    %cst_34 = arith.constant 3.200000e+01 : f32
    %56 = vector.broadcast %cst_34 : f32 to vector<16x1xf32>
    %57 = arith.divf %55, %56 : vector<16x1xf32>
    %58 = vector.broadcast %57 : vector<16x1xf32> to vector<16x32xf32>
    %59 = arith.subf %53, %58 : vector<16x32xf32>
    %60 = arith.mulf %59, %59 : vector<16x32xf32>
    %cst_35 = arith.constant dense<0.000000e+00> : vector<16xf32>
    %61 = vector.multi_reduction <add>, %60, %cst_35 [1] : vector<16x32xf32> to vector<16xf32>
    %62 = vector.shape_cast %61 : vector<16xf32> to vector<16x1xf32>
    %cst_36 = arith.constant 3.200000e+01 : f32
    %63 = vector.broadcast %cst_36 : f32 to vector<16x1xf32>
    %64 = arith.divf %62, %63 : vector<16x1xf32>
    %cst_37 = arith.constant 9.99999974E-6 : f32
    %65 = vector.broadcast %cst_37 : f32 to vector<16x1xf32>
    %66 = arith.addf %64, %65 : vector<16x1xf32>
    %67 = math.rsqrt %66 : vector<16x1xf32>
    %68 = vector.broadcast %67 : vector<16x1xf32> to vector<16x32xf32>
    %69 = arith.mulf %59, %68 : vector<16x32xf32>
    %70 = vector.broadcast %16 : vector<1x32xf32> to vector<16x32xf32>
    %71 = arith.mulf %69, %70 : vector<16x32xf32>
    %72 = vector.broadcast %17 : vector<1x32xf32> to vector<16x32xf32>
    %73 = arith.addf %71, %72 : vector<16x32xf32>
    %cst_38 = arith.constant dense<0.000000e+00> : vector<16x64xf32>
    %74 = tpu.matmul %73, %8, %cst_38 {dimension_numbers = #tpu.dot_dimension_numbers<[1], [0], [0], [1], [0, 0, 1, 1], [], []>} : vector<16x32xf32>, vector<32x64xf32>, vector<16x64xf32> -> vector<16x64xf32>
    %75 = vector.broadcast %14 : vector<1x64xf32> to vector<16x64xf32>
    %76 = arith.addf %74, %75 : vector<16x64xf32>
    %cst_39 = arith.constant 0.000000e+00 : f32
    %77 = vector.broadcast %cst_39 : f32 to vector<16x64xf32>
    %78 = arith.maximumf %76, %77 : vector<16x64xf32>
    %cst_40 = arith.constant dense<0.000000e+00> : vector<16x32xf32>
    %79 = tpu.matmul %78, %9, %cst_40 {dimension_numbers = #tpu.dot_dimension_numbers<[1], [0], [0], [1], [0, 0, 1, 1], [], []>} : vector<16x64xf32>, vector<64x32xf32>, vector<16x32xf32> -> vector<16x32xf32>
    %80 = vector.broadcast %15 : vector<1x32xf32> to vector<16x32xf32>
    %81 = arith.addf %79, %80 : vector<16x32xf32>
    %82 = arith.addf %73, %81 : vector<16x32xf32>
    %cst_41 = arith.constant dense<0.000000e+00> : vector<16xf32>
    %83 = vector.multi_reduction <add>, %82, %cst_41 [1] : vector<16x32xf32> to vector<16xf32>
    %84 = vector.shape_cast %83 : vector<16xf32> to vector<16x1xf32>
    %cst_42 = arith.constant 3.200000e+01 : f32
    %85 = vector.broadcast %cst_42 : f32 to vector<16x1xf32>
    %86 = arith.divf %84, %85 : vector<16x1xf32>
    %87 = vector.broadcast %86 : vector<16x1xf32> to vector<16x32xf32>
    %88 = arith.subf %82, %87 : vector<16x32xf32>
    %89 = arith.mulf %88, %88 : vector<16x32xf32>
    %cst_43 = arith.constant dense<0.000000e+00> : vector<16xf32>
    %90 = vector.multi_reduction <add>, %89, %cst_43 [1] : vector<16x32xf32> to vector<16xf32>
    %91 = vector.shape_cast %90 : vector<16xf32> to vector<16x1xf32>
    %cst_44 = arith.constant 3.200000e+01 : f32
    %92 = vector.broadcast %cst_44 : f32 to vector<16x1xf32>
    %93 = arith.divf %91, %92 : vector<16x1xf32>
    %cst_45 = arith.constant 9.99999974E-6 : f32
    %94 = vector.broadcast %cst_45 : f32 to vector<16x1xf32>
    %95 = arith.addf %93, %94 : vector<16x1xf32>
    %96 = math.rsqrt %95 : vector<16x1xf32>
    %97 = vector.broadcast %96 : vector<16x1xf32> to vector<16x32xf32>
    %98 = arith.mulf %88, %97 : vector<16x32xf32>
    %99 = vector.broadcast %18 : vector<1x32xf32> to vector<16x32xf32>
    %100 = arith.mulf %98, %99 : vector<16x32xf32>
    %101 = vector.broadcast %19 : vector<1x32xf32> to vector<16x32xf32>
    %102 = arith.addf %100, %101 : vector<16x32xf32>
    %c0_46 = arith.constant 0 : index
    %c0_47 = arith.constant 0 : index
    %103 = vector.load %arg2[%c0_46, %c0_47] : memref<16x32xf32, #tpu.memory_space<vmem>>, vector<16x32xf32>
    tpu.vector_store %arg2[%c0_46, %c0_47], %102 {strides = array<i32>} : memref<16x32xf32, #tpu.memory_space<vmem>>, vector<16x32xf32>,
    return
  }
}

</mosaic_0001>

<bundles_post_ra>
// kernel: transformer_decoder_layer.1
= control target key start
LH: loop header
LB: loop body
LE: loop exit
PB: predicated region body
PF: predicated region fallthrough
CT: control target
= control target key end

     0   :  { %7 = vsyncpa [#allocation3], 0  ;;  %s958_s0 = inlined_call_operand.vmem [shape: f32[96,32], index: 0, kind: input, shape index: {}]   ;;  %s959_s1 = inlined_call_operand.hbm [shape: f32[384,128], index: 1, kind: input, shape index: {}]   ;;  %s960_s2 = inlined_call_operand.hbm [shape: f32[16,32], index: 2, kind: output, shape index: {}]  }
   0x1   :  { %8 = vsyncpa [#allocation4], 0  ;;  %s15_s11 = sshll.u32 %s959_s1, 4  ;;  %s734_s12 = smov [#allocation2]   ;;  %s16_s11 = int_to_ptr.hbm [resolvable:$true] %s15_s11 }
   0x2   :  { %s17_s13 = sshll.u32 %s734_s12, 4  ;;  %s735_s14 = smov 128   ;;  %s18_s13 = int_to_ptr.vmem [resolvable:$true] %s17_s13 }
   0x3   :  { %s736_s15 = smov 8  }
   0x4   :  { %23 = dma.hbm_to_vmem [thread:$0]  %s16_s11, 6144, %s18_s13, [#allocation3], %s735_s14, %s735_s14, %s736_s15  }
   0x5   :  { %730 = dma.done.wait [#allocation3], 6144  }
   0x6   :  { %731 = vsyncadd [#allocation3], 4294961152  ;;  %v47_v0 = vld [vmem:[#allocation2 + $0x38] sm:$0xff]  ;;  %v46_v1 = vld [vmem:[#allocation2 + $0x30] sm:$0xff]  ;;  %vm103_vm0 = vcmask 261120   ;;  %vm512_vm8 = vcmask 523264  }
   0x7   :  { %158 = vmatpush.msra.mxu1 %v47_v0  ;;  %v763_v2 = vld [vmem:[%s958_s0 + $0x20] sm:$0xff]  ;;  %v45_v4 = vld [vmem:[#allocation2 + $0x28] sm:$0xff]  ;;  %v43_v7 = vld [vmem:[#allocation2 + $0x18] sm:$0xff]  ;;  %s602_s16 = sshll.u32 %s960_s2, 4  ;;  %s603_s16 = int_to_ptr.hbm [resolvable:$true] %s602_s16 }
   0x8   :  { %v36_v3 = vld [vmem:[%s958_s0 + $0x40] sm:$0xff]  ;;  %v42_v8 = vld [vmem:[#allocation2 + $0x10] sm:$0xff]  ;;  %122 = vmatpush.msra.mxu0 %v43_v7  ;;  %v41_v11 = vld [vmem:[#allocation2 + $0x8] sm:$0xff] }
   0x9   :  { %159 = vmatpush.msra.mxu1 %v46_v1  ;;  %v44_v5 = vld [vmem:[#allocation2 + $0x20] sm:$0xff]  ;;  %v98_v6 = vadd.f32 %v36_v3, %v763_v2  ;;  %v30_v10 = vld [vmem:[%s958_s0 + $0x10] sm:$0xff]  ;;  %v780_v12 = vld [vmem:[%s958_s0 + $0x28] sm:$0xff] }
   0xa   :  { %v772_v9 = vld [vmem:[%s958_s0] sm:$0xff]  ;;  %v37_v13 = vld [vmem:[%s958_s0 + $0x48] sm:$0xff]  ;;  %123 = vmatpush.msra.mxu0 %v42_v8  ;;  %v31_v18 = vld [vmem:[%s958_s0 + $0x18] sm:$0xff] }
   0xb   :  { %160 = vmatpush.msra.mxu1 %v45_v4  ;;  %v40_v14 = vld [vmem:[#allocation2] sm:$0xff]  ;;  %v96_v15 = vadd.f32 %v30_v10, %v772_v9  ;;  %v99_v16 = vadd.f32 %v37_v13, %v780_v12  ;;  %v792_v17 = vld [vmem:[%s958_s0 + $0x8] sm:$0xff]  ;;  %v802_v20 = vld [vmem:[%s958_s0 + $0x30] sm:$0xff] }
   0xc   :  { %124 = vmatpush.msra.mxu0 %v41_v11  ;;  %v97_v19 = vadd.f32 %v31_v18, %v792_v17  ;;  %v38_v21 = vld [vmem:[%s958_s0 + $0x50] sm:$0xff]  ;;  %v813_v23 = vld [vmem:[%s958_s0 + $0x38] sm:$0xff]  ;;  %v826_v28 = vld [vmem:[#allocation2 + $0x168] sm:$0xff] }
   0xd   :  { %161 = vmatpush.msra.mxu1 %v44_v5  ;;  %v100_v22 = vadd.f32 %v38_v21, %v802_v20  ;;  %v39_v24 = vld [vmem:[%s958_s0 + $0x58] sm:$0xff]  ;;  %v823_v27 = vld [vmem:[#allocation2 + $0x170] sm:$0xff]  ;;  %v829_v29 = vld [vmem:[#allocation2 + $0x160] sm:$0xff]  ;;  %s738_s0 = smov [#allocation5]  }
   0xe   :  { %617 = vmatmul.msk.f32.vlgmr.msra.gmra.mxu1 %vm103_vm0, %v98_v6  ;;  %125 = vmatpush.msra.mxu0 %v40_v14  ;;  %v101_v25 = vadd.f32 %v39_v24, %v813_v23  ;;  %v820_v26 = vld [vmem:[#allocation2 + $0x178] sm:$0xff]  ;;  %v835_v32 = vld [vmem:[#allocation2 + $0x150] sm:$0xff]  ;;  %v838_v33 = vld [vmem:[#allocation2 + $0x148] sm:$0xff]  ;;  %s600_s11 = sshll.u32 %s738_s0, 4  ;;  %s601_s11 = int_to_ptr.vmem [resolvable:$true] %s600_s11 }
   0xf   :  { %615 = vmatmul.msk.f32.vlgmr.msra.gmra.mxu0 %vm103_vm0, %v96_v15  ;;  %v832_v31 = vld [vmem:[#allocation2 + $0x158] sm:$0xff]  ;;  %v841_v34 = vld [vmem:[#allocation2 + $0x140] sm:$0xff]  ;;  %v847_v37 = vld [vmem:[#allocation2 + $0x130] sm:$0xff] }
  0x10   :  { %340 = vmatpush.msrb.mxu0 %v820_v26  ;;  %v844_v36 = vld [vmem:[#allocation2 + $0x138] sm:$0xff]  ;;  %v850_v38 = vld [vmem:[#allocation2 + $0x128] sm:$0xff]  ;;  %v853_v39 = vld [vmem:[#allocation2 + $0x120] sm:$0xff] }
  0x11   :  { %v856_v41 = vld [vmem:[#allocation2 + $0x118] sm:$0xff]  ;;  %v859_v42 = vld [vmem:[#allocation2 + $0x110] sm:$0xff]  ;;  %v862_v43 = vld [vmem:[#allocation2 + $0x108] sm:$0xff] }
  0x12   :  { %341 = vmatpush.msrb.mxu0 %v823_v27  ;;  %v654_v44 = vld [vmem:[#allocation2 + $0xe1] ss:$0 sm:$0xff]  ;;  %v51_v62 = vld [vmem:[#allocation2 + $0x58] sm:$0xff]  ;;  %v50_v63 = vld [vmem:[#allocation2 + $0x50] sm:$0xff] }
  0x13   :  { %v865_v45 = vld [vmem:[#allocation2 + $0x100] sm:$0xff]  ;;  %200 = vmatpush.msra.mxu2 %v51_v62  ;;  %v49_v0 = vld [vmem:[#allocation2 + $0x48] sm:$0xff] }
  0x14   :  { %342 = vmatpush.msrb.mxu0 %v826_v28  ;;  %v48_v3 = vld [vmem:[#allocation2 + $0x40] sm:$0xff] }
  0x15   :  { %201 = vmatpush.msra.mxu2 %v50_v63  ;;  %v655_v8 = vld [vmem:[#allocation2 + $0xe0] ss:$0 sm:$0xff] }
  0x16   :  { %618 = vmatmul.msk.f32.gmra.mxu1 %vm103_vm0, %v99_v16  ;;  %343 = vmatpush.msrb.mxu0 %v829_v29  ;;  %v78_v16 = vld [vmem:[#allocation2 + $0xf0] sm:$0xff] }
  0x17   :  { %616 = vmatmul.msk.f32.gmra.mxu0 %vm103_vm0, %v97_v19  ;;  %202 = vmatpush.msra.mxu2 %v49_v0 }
  0x18   :  { %344 = vmatpush.msrb.mxu0 %v832_v31 }
  0x19   :  { %203 = vmatpush.msra.mxu2 %v48_v3 }
  0x1a   :  { %345 = vmatpush.msrb.mxu0 %v835_v32  ;;  %621 = vmatmul.msk.f32.vlgmr.msra.gmra.mxu2 %vm103_vm0, %v763_v2 }
  0x1c   :  { %346 = vmatpush.msrb.mxu0 %v838_v33 }
  0x1e   :  { %619 = vmatmul.msk.f32.gmra.mxu1 %vm103_vm0, %v100_v22  ;;  %347 = vmatpush.msrb.mxu0 %v841_v34  ;;  %v656_v22 = vld [vmem:[#allocation2 + $0xe2] ss:$0 sm:$0xff] }
  0x20   :  { %348 = vmatpush.msrb.mxu0 %v844_v36 }
  0x22   :  { %349 = vmatpush.msrb.mxu0 %v847_v37  ;;  %622 = vmatmul.msk.f32.gmra.mxu2 %vm103_vm0, %v780_v12 }
  0x24   :  { %350 = vmatpush.msrb.mxu0 %v850_v38 }
  0x26   :  { %620 = vmatmul.msk.f32.gmra.mxu1 %vm103_vm0, %v101_v25  ;;  %351 = vmatpush.msrb.mxu0 %v853_v39 }
  0x28   :  { %352 = vmatpush.msrb.mxu0 %v856_v41 }
  0x2a   :  { %353 = vmatpush.msrb.mxu0 %v859_v42  ;;  %623 = vmatmul.msk.f32.gmra.mxu2 %vm103_vm0, %v802_v20 }
  0x2c   :  { %354 = vmatpush.msrb.mxu0 %v862_v43 }
  0x2e   :  { %355 = vmatpush.msrb.mxu0 %v865_v45 }
  0x32   :  { %624 = vmatmul.msk.f32.gmra.mxu2 %vm103_vm0, %v813_v23 }
  0x8b   :  { %v163_v30 = vpop.f32.mrf.mxu1 }
  0x8c   :  { %v164_v52 = vadd.f32 %v654_v44, %v163_v30  ;;  %v127_v7 = vpop.f32.mrf.mxu0  ;;  %v79_v30 = vld [vmem:[#allocation2 + $0xf8] sm:$0xff] }
  0x8d   :  { %v128_v11 = vadd.f32 %v655_v8, %v127_v7 }
  0x8e   :  { %v229_v54 = vmul.f32 %v164_v52, %v829_v29  ;;  %v225_v58 = vmul.f32 %v164_v52, %v841_v34  ;;  %v221_v1 = vmul.f32 %v164_v52, %v853_v39  ;;  %v217_v10 = vmul.f32 %v164_v52, %v865_v45 }
  0x93   :  { %v166_v35 = vpop.f32.mrf.mxu1 }
  0x94   :  { %v167_v50 = vadd.f32 %v654_v44, %v166_v35  ;;  %v130_v2 = vpop.f32.mrf.mxu0 }
  0x95   :  { %v131_v13 = vadd.f32 %v655_v8, %v130_v2 }
  0x96   :  { %v230_v53 = vmul.f32 %v167_v50, %v826_v28  ;;  %v226_v57 = vmul.f32 %v167_v50, %v838_v33  ;;  %v222_v61 = vmul.f32 %v167_v50, %v850_v38  ;;  %v218_v6 = vmul.f32 %v167_v50, %v862_v43 }
  0x9b   :  { %v169_v40 = vpop.f32.mrf.mxu1 }
  0x9c   :  { %v170_v48 = vadd.f32 %v654_v44, %v169_v40 }
  0x9d   :  { %v205_v12 = vpop.f32.mrf.mxu2 }
  0x9e   :  { %v231_v51 = vmul.f32 %v170_v48, %v823_v27  ;;  %v227_v56 = vmul.f32 %v170_v48, %v835_v32  ;;  %v223_v60 = vmul.f32 %v170_v48, %v847_v37  ;;  %v219_v5 = vmul.f32 %v170_v48, %v859_v42 }
  0xa3   :  { %v172_v46 = vpop.f32.mrf.mxu1 }
  0xa4   :  { %v173_v47 = vadd.f32 %v654_v44, %v172_v46 }
  0xa5   :  { %v208_v14 = vpop.f32.mrf.mxu2 }
  0xa6   :  { %v232_v49 = vmul.f32 %v173_v47, %v820_v26  ;;  %v228_v55 = vmul.f32 %v173_v47, %v832_v31  ;;  %v224_v59 = vmul.f32 %v173_v47, %v844_v36  ;;  %v220_v4 = vmul.f32 %v173_v47, %v856_v41 }
  0xa7   :  { %v209_v40 = vadd.f32 %v656_v22, %v208_v14  ;;  %v206_v47 = vadd.f32 %v656_v22, %v205_v12  ;;  %v737_v12 = vmov 32.0  }
  0xa8   :  { %625 = vmatpush.xpose.msk.msra.mxu3 %vm103_vm0, %v232_v49 }
  0xa9   :  { %v246_v49 = vmul.f32 %v209_v40, %v826_v28  ;;  %v245_v50 = vmul.f32 %v206_v47, %v829_v29  ;;  %v238_v29 = vmul.f32 %v209_v40, %v850_v38  ;;  %v53_v38 = vld [vmem:[#allocation2 + $0x68] sm:$0xff] }
  0xac   :  { %626 = vmatpush.xpose.msk.msra.mxu3 %vm103_vm0, %v231_v51 }
  0xad   :  { %v211_v18 = vpop.f32.mrf.mxu2 }
  0xae   :  { %v212_v24 = vadd.f32 %v656_v22, %v211_v18 }
  0xb0   :  { %627 = vmatpush.xpose.msk.msra.mxu3 %vm103_vm0, %v230_v53  ;;  %v247_v48 = vmul.f32 %v212_v24, %v823_v27  ;;  %v243_v52 = vmul.f32 %v212_v24, %v835_v32  ;;  %v242_v53 = vmul.f32 %v209_v40, %v838_v33  ;;  %v239_v28 = vmul.f32 %v212_v24, %v847_v37  ;;  %v55_v37 = vld [vmem:[#allocation2 + $0x78] sm:$0xff] }
  0xb1   :  { %v235_v33 = vmul.f32 %v212_v24, %v859_v42  ;;  %409 = vmatpush.msrb.mxu2 %v55_v37 }
  0xb4   :  { %628 = vmatpush.xpose.msk.msra.mxu3 %vm103_vm0, %v229_v54  ;;  %v54_v54 = vld [vmem:[#allocation2 + $0x70] sm:$0xff] }
  0xb5   :  { %v214_v20 = vpop.f32.mrf.mxu2  ;;  %410 = vmatpush.msrb.mxu2 %v54_v54 }
  0xb6   :  { %v215_v44 = vadd.f32 %v656_v22, %v214_v20 }
  0xb7   :  { %411 = vmatpush.msrb.mxu2 %v53_v38 }
  0xb8   :  { %629 = vmatpush.xpose.msk.msra.mxu3 %vm103_vm0, %v228_v55  ;;  %v248_v23 = vmul.f32 %v215_v44, %v820_v26  ;;  %v244_v51 = vmul.f32 %v215_v44, %v832_v31  ;;  %v241_v26 = vmul.f32 %v206_v47, %v841_v34  ;;  %v240_v27 = vmul.f32 %v215_v44, %v844_v36 }
  0xb9   :  { %v237_v31 = vmul.f32 %v206_v47, %v853_v39  ;;  %v236_v32 = vmul.f32 %v215_v44, %v856_v41  ;;  %v234_v34 = vmul.f32 %v209_v40, %v862_v43  ;;  %v233_v36 = vmul.f32 %v206_v47, %v865_v45  ;;  %v52_v45 = vld [vmem:[#allocation2 + $0x60] sm:$0xff]  ;;  %v58_v47 = vld [vmem:[#allocation2 + $0x90] sm:$0xff] }
  0xba   :  { %363 = vmatpush.msrb.mxu1 %v248_v23  ;;  %412 = vmatpush.msrb.mxu2 %v52_v45  ;;  %v57_v23 = vld [vmem:[#allocation2 + $0x88] sm:$0xff] }
  0xbc   :  { %630 = vmatpush.xpose.msk.msra.mxu3 %vm103_vm0, %v227_v56  ;;  %364 = vmatpush.msrb.mxu1 %v247_v48  ;;  %v56_v48 = vld [vmem:[#allocation2 + $0x80] sm:$0xff] }
  0xbe   :  { %365 = vmatpush.msrb.mxu1 %v246_v49 }
  0xc0   :  { %631 = vmatpush.xpose.msk.msra.mxu3 %vm103_vm0, %v226_v57  ;;  %366 = vmatpush.msrb.mxu1 %v245_v50 }
  0xc2   :  { %367 = vmatpush.msrb.mxu1 %v244_v51 }
  0xc4   :  { %632 = vmatpush.xpose.msk.msra.mxu3 %vm103_vm0, %v225_v58  ;;  %368 = vmatpush.msrb.mxu1 %v243_v52  ;;  %v67_v52 = vld [vmem:[#allocation2 + $0xd8] sm:$0xff] }
  0xc6   :  { %369 = vmatpush.msrb.mxu1 %v242_v53  ;;  %v66_v53 = vld [vmem:[#allocation2 + $0xd0] sm:$0xff] }
  0xc8   :  { %633 = vmatpush.xpose.msk.msra.mxu3 %vm103_vm0, %v224_v59  ;;  %370 = vmatpush.msrb.mxu1 %v241_v26  ;;  %v65_v26 = vld [vmem:[#allocation2 + $0xc8] sm:$0xff] }
  0xca   :  { %371 = vmatpush.msrb.mxu1 %v240_v27 }
  0xcc   :  { %634 = vmatpush.xpose.msk.msra.mxu3 %vm103_vm0, %v223_v60  ;;  %372 = vmatpush.msrb.mxu1 %v239_v28 }
  0xce   :  { %373 = vmatpush.msrb.mxu1 %v238_v29  ;;  %v64_v29 = vld [vmem:[#allocation2 + $0xc0] sm:$0xff] }
  0xd0   :  { %635 = vmatpush.xpose.msk.msra.mxu3 %vm103_vm0, %v222_v61  ;;  %374 = vmatpush.msrb.mxu1 %v237_v31 }
  0xd2   :  { %375 = vmatpush.msrb.mxu1 %v236_v32 }
  0xd4   :  { %636 = vmatpush.xpose.msk.msra.mxu3 %vm103_vm0, %v221_v1  ;;  %376 = vmatpush.msrb.mxu1 %v235_v33  ;;  %v63_v33 = vld [vmem:[#allocation2 + $0xb8] sm:$0xff] }
  0xd6   :  { %377 = vmatpush.msrb.mxu1 %v234_v34 }
  0xd8   :  { %637 = vmatpush.xpose.msk.msra.mxu3 %vm103_vm0, %v220_v4  ;;  %378 = vmatpush.msrb.mxu1 %v233_v36  ;;  %v657_v4 = vld [vmem:[#allocation2 + $0xe3] ss:$0 sm:$0xff]  ;;  %v62_v36 = vld [vmem:[#allocation2 + $0xb0] sm:$0xff] }
  0xda   :  { %527 = vmatpush.msra.mxu1 %v67_v52 }
  0xdc   :  { %638 = vmatpush.xpose.msk.msra.mxu3 %vm103_vm0, %v219_v5  ;;  %528 = vmatpush.msra.mxu1 %v66_v53 }
  0xde   :  { %529 = vmatpush.msra.mxu1 %v65_v26 }
  0xe0   :  { %639 = vmatpush.xpose.msk.msra.mxu3 %vm103_vm0, %v218_v6  ;;  %530 = vmatpush.msra.mxu1 %v64_v29 }
  0xe2   :  { %531 = vmatpush.msra.mxu1 %v63_v33 }
  0xe4   :  { %640 = vmatpush.xpose.msk.msra.mxu3 %vm103_vm0, %v217_v10  ;;  %532 = vmatpush.msra.mxu1 %v62_v36  ;;  %v662_v36 = vld [vmem:[#allocation2 + $0xe8] ss:$0 sm:$0xff] }
  0xe7   :  { %641 = vmatmul.msk.f32.vlgmr.msra.gmra.mxu3 %vm103_vm0, %v128_v11 }
  0xef   :  { %642 = vmatmul.msk.f32.gmra.mxu3 %vm103_vm0, %v131_v13 }
 0x16a   :  { %v320_v15 = vpop.f32.mrf.mxu3 }
 0x16b   :  { %v326_v19 = vmul.f32 0.35355338, %v320_v15 }
 0x16d   :  { %v328_v21 = vadd.f32 %v326_v19, %v78_v16 }
 0x16f   :  { %330 = vmax.xlane.f32.xlu0 %v328_v21 }
 0x172   :  { %v323_v25 = vpop.f32.mrf.mxu3 }
 0x173   :  { %v327_v35 = vmul.f32 0.35355338, %v323_v25 }
 0x175   :  { %v329_v46 = vadd.f32 %v327_v35, %v79_v30 }
 0x177   :  { %332 = vmax.xlane.f32.xlu0 %v329_v46 }
 0x1e2   :  { %v331_v39 = vpop.xlane.xlu0 %330 }
 0x1e3   :  { %v334_v55 = vsub.f32 %v328_v21, %v331_v39 }
 0x1e5   :  { %v336_v41 = vmul.f32 1.442695, %v334_v55 }
 0x1e7   :  { %664 = vpow2.f32 %v336_v41 }
 0x1ea   :  { %v333_v56 = vpop.xlane.xlu0 %332 }
 0x1eb   :  { %v335_v42 = vsub.f32 %v329_v46, %v333_v56  ;;  %v59_v46 = vld [vmem:[#allocation2 + $0x98] sm:$0xff]  ;;  %v658_v56 = vld [vmem:[#allocation2 + $0xe6] ss:$0 sm:$0xff] }
 0x1ec   :  { %498 = vmatpush.msra.mxu0 %v59_v46 }
 0x1ed   :  { %v665_v57 = vpop.eup %664  ;;  %v338_v58 = vmul.f32 1.442695, %v335_v42 }
 0x1ee   :  { %356 = vmatmul.f32.vlgmr.msrb.gmra.mxu0 %v665_v57  ;;  %379 = vmatmul.f32.vlgmr.msrb.gmra.mxu1 %v665_v57 }
 0x1ef   :  { %666 = vpow2.f32 %v338_v58  ;;  %499 = vmatpush.msra.mxu0 %v58_v47 }
 0x1f1   :  { %500 = vmatpush.msra.mxu0 %v57_v23 }
 0x1f3   :  { %501 = vmatpush.msra.mxu0 %v56_v48 }
 0x1f5   :  { %v667_v43 = vpop.eup %666 }
 0x1f6   :  { %359 = vmatmul.f32.gmra.mxu0 %v667_v43  ;;  %382 = vmatmul.f32.gmra.mxu1 %v667_v43  ;;  %v659_v43 = vld [vmem:[#allocation2 + $0xe7] ss:$0 sm:$0xff] }
 0x26b   :  { %v357_v59 = vpop.f32.mrf.mxu0  ;;  %v380_v60 = vpop.f32.mrf.mxu1 }
 0x26c   :  { %668 = vrcp.f32 %v357_v59 }
 0x272   :  { %v669_v61 = vpop.eup %668 }
 0x273   :  { %v388_v62 = vmul.f32 %v669_v61, %v380_v60  ;;  %v360_v63 = vpop.f32.mrf.mxu0  ;;  %v383_v1 = vpop.f32.mrf.mxu1 }
 0x274   :  { %670 = vrcp.f32 %v360_v63 }
 0x275   :  { %643 = vmatmul.msk.f32.vlgmr.msrb.gmra.mxu2 %vm103_vm0, %v388_v62  ;;  %672 = vrcp.f32 %v737_v12  ;;  %v661_v12 = vld [vmem:[#allocation2 + $0xe5] ss:$0 sm:$0xff] }
 0x27a   :  { %v671_v0 = vpop.eup %670 }
 0x27b   :  { %v389_v3 = vmul.f32 %v671_v0, %v383_v1  ;;  %v673_v14 = vpop.eup %672 }
 0x27c   :  { %v429_v15 = vmul.f32 32.0, %v673_v14  ;;  %vm433_vm1 = vweird.f32 %v673_v14 }
 0x27d   :  { %644 = vmatmul.msk.f32.gmra.mxu2 %vm103_vm0, %v389_v3 }
 0x27e   :  { %v430_v16 = vsub.f32 1.0, %v429_v15 }
 0x280   :  { %v431_v18 = vmul.f32 %v673_v14, %v430_v16 }
 0x282   :  { %v432_v19 = vadd.f32 %v673_v14, %v431_v18 }
 0x284   :  { %v932_v21 = vsel %vm433_vm1, %v673_v14, %v432_v19 }
 0x2f8   :  { %v414_v5 = vpop.f32.mrf.mxu2 }
 0x2f9   :  { %v415_v6 = vadd.f32 %v657_v4, %v414_v5  ;;  %v60_v5 = vld [vmem:[#allocation2 + $0xa0] sm:$0xff] }
 0x2fb   :  { %v420_v7 = vadd.f32 %v415_v6, %v772_v9  ;;  %v660_v6 = vld [vmem:[#allocation2 + $0xe4] ss:$0 sm:$0xff] }
 0x2fd   :  { %v422_v8 = vsel %vm103_vm0, %v420_v7, 0.0 }
 0x2fe   :  { %423 = vadd.xlane.f32.xlu1 %v422_v8 }
 0x300   :  { %v417_v10 = vpop.f32.mrf.mxu2 }
 0x301   :  { %v418_v11 = vadd.f32 %v657_v4, %v417_v10  ;;  %v61_v4 = vld [vmem:[#allocation2 + $0xa8] sm:$0xff] }
 0x302   :  { %533 = vmatpush.msra.mxu1 %v61_v4 }
 0x303   :  { %v421_v2 = vadd.f32 %v418_v11, %v792_v17 }
 0x304   :  { %534 = vmatpush.msra.mxu1 %v60_v5 }
 0x305   :  { %v425_v13 = vsel %vm103_vm0, %v421_v2, 0.0 }
 0x306   :  { %426 = vadd.xlane.f32.xlu1 %v425_v13 }
 0x371   :  { %v424_v9 = vpop.xlane.xlu1 %423 }
 0x372   :  { %v435_v22 = vmul.f32 %v932_v21, %v424_v9 }
 0x374   :  { %v437_v24 = vsub.f32 %v420_v7, %v435_v22 }
 0x376   :  { %v439_v25 = vmul.f32 %v437_v24, %v437_v24 }
 0x378   :  { %v441_v17 = vsel %vm103_vm0, %v439_v25, 0.0 }
 0x379   :  { %442 = vadd.xlane.f32.xlu2 %v441_v17  ;;  %v427_v30 = vpop.xlane.xlu1 %426 }
 0x37a   :  { %v436_v20 = vmul.f32 %v932_v21, %v427_v30 }
 0x37c   :  { %v438_v35 = vsub.f32 %v421_v2, %v436_v20 }
 0x37e   :  { %v440_v40 = vmul.f32 %v438_v35, %v438_v35 }
 0x380   :  { %v444_v44 = vsel %vm103_vm0, %v440_v40, 0.0 }
 0x381   :  { %445 = vadd.xlane.f32.xlu2 %v444_v44 }
 0x3ec   :  { %v443_v49 = vpop.xlane.xlu2 %442 }
 0x3ed   :  { %v447_v50 = vmul.f32 %v443_v49, %v932_v21 }
 0x3ef   :  { %v449_v51 = vadd.f32 1e-05, %v447_v50 }
 0x3f1   :  { %674 = vrsqrt.f32 %v449_v51  ;;  %vm457_vm3 = vweird.f32 %v449_v51 }
 0x3f4   :  { %v446_v27 = vpop.xlane.xlu2 %445 }
 0x3f5   :  { %v448_v28 = vmul.f32 %v446_v27, %v932_v21 }
 0x3f7   :  { %v675_v31 = vpop.eup %674  ;;  %v450_v32 = vadd.f32 1e-05, %v448_v28 }
 0x3f8   :  { %v452_v34 = vmul.f32 %v675_v31, %v449_v51  ;;  %vm458_vm2 = vweird.f32 %v675_v31 }
 0x3f9   :  { %676 = vrsqrt.f32 %v450_v32  ;;  %vm459_vm4 = vmor %vm457_vm3, %vm458_vm2  ;;  %vm467_vm6 = vweird.f32 %v450_v32 }
 0x3fa   :  { %v453_v37 = vmul.f32 %v675_v31, %v452_v34 }
 0x3fc   :  { %v454_v54 = vmul.f32 0.5, %v453_v37 }
 0x3fe   :  { %v455_v38 = vsub.f32 1.5, %v454_v54 }
 0x3ff   :  { %v677_v39 = vpop.eup %676 }
 0x400   :  { %v456_v55 = vmul.f32 %v675_v31, %v455_v38  ;;  %v462_v41 = vmul.f32 %v677_v39, %v450_v32  ;;  %vm468_vm5 = vweird.f32 %v677_v39 }
 0x401   :  { %vm469_vm7 = vmor %vm467_vm6, %vm468_vm5 }
 0x402   :  { %v460_v42 = vsel %vm459_vm4, %v675_v31, %v456_v55  ;;  %v463_v57 = vmul.f32 %v677_v39, %v462_v41 }
 0x403   :  { %v471_v58 = vmul.f32 %v460_v42, %v437_v24 }
 0x404   :  { %v464_v45 = vmul.f32 0.5, %v463_v57 }
 0x405   :  { %v474_v59 = vmul.f32 %v658_v56, %v471_v58 }
 0x406   :  { %v465_v60 = vsub.f32 1.5, %v464_v45 }
 0x407   :  { %v477_v61 = vadd.f32 %v659_v43, %v474_v59 }
 0x408   :  { %v466_v62 = vmul.f32 %v677_v39, %v465_v60 }
 0x409   :  { %645 = vmatmul.msk.f32.vlgmr.msra.gmra.mxu0 %vm103_vm0, %v477_v61 }
 0x40a   :  { %v470_v63 = vsel %vm469_vm7, %v677_v39, %v466_v62  ;;  %v663_v39 = vld [vmem:[#allocation2 + $0xe9] ss:$0 sm:$0xff] }
 0x40b   :  { %v472_v0 = vmul.f32 %v470_v63, %v438_v35 }
 0x40d   :  { %v475_v1 = vmul.f32 %v658_v56, %v472_v0 }
 0x40f   :  { %v478_v3 = vadd.f32 %v659_v43, %v475_v1 }
 0x411   :  { %646 = vmatmul.msk.f32.gmra.mxu0 %vm103_vm0, %v478_v3 }
 0x486   :  { %v503_v7 = vpop.f32.mrf.mxu0 }
 0x487   :  { %v504_v8 = vadd.f32 %v660_v6, %v503_v7 }
 0x489   :  { %v509_v10 = vmax.f32 %v504_v8, 0.0 }
 0x48b   :  { %647 = vmatmul.msk.f32.vlgmr.msra.gmra.mxu1 %vm512_vm8, %v509_v10 }
 0x48e   :  { %v506_v11 = vpop.f32.mrf.mxu0 }
 0x48f   :  { %v507_v2 = vadd.f32 %v660_v6, %v506_v11 }
 0x491   :  { %v510_v13 = vmax.f32 %v507_v2, 0.0 }
 0x493   :  { %648 = vmatmul.msk.f32.gmra.mxu1 %vm512_vm8, %v510_v13 }
 0x508   :  { %v536_v14 = vpop.f32.mrf.mxu1 }
 0x509   :  { %v537_v15 = vadd.f32 %v661_v12, %v536_v14 }
 0x50b   :  { %v542_v16 = vadd.f32 %v537_v15, %v477_v61 }
 0x50d   :  { %v544_v18 = vsel %vm103_vm0, %v542_v16, 0.0 }
 0x50e   :  { %545 = vadd.xlane.f32.xlu0 %v544_v18 }
 0x510   :  { %v539_v19 = vpop.f32.mrf.mxu1 }
 0x511   :  { %v540_v9 = vadd.f32 %v661_v12, %v539_v19 }
 0x513   :  { %v543_v22 = vadd.f32 %v540_v9, %v478_v3 }
 0x515   :  { %v547_v24 = vsel %vm103_vm0, %v543_v22, 0.0 }
 0x516   :  { %548 = vadd.xlane.f32.xlu1 %v547_v24 }
 0x581   :  { %v546_v25 = vpop.xlane.xlu0 %545 }
 0x582   :  { %v550_v17 = vmul.f32 %v546_v25, %v932_v21 }
 0x584   :  { %v552_v30 = vsub.f32 %v542_v16, %v550_v17 }
 0x586   :  { %v554_v20 = vmul.f32 %v552_v30, %v552_v30 }
 0x588   :  { %v556_v35 = vsel %vm103_vm0, %v554_v20, 0.0 }
 0x589   :  { %557 = vadd.xlane.f32.xlu2 %v556_v35  ;;  %v549_v40 = vpop.xlane.xlu1 %548 }
 0x58a   :  { %v551_v44 = vmul.f32 %v549_v40, %v932_v21 }
 0x58c   :  { %v553_v46 = vsub.f32 %v543_v22, %v551_v44 }
 0x58e   :  { %v555_v47 = vmul.f32 %v553_v46, %v553_v46 }
 0x590   :  { %v559_v23 = vsel %vm103_vm0, %v555_v47, 0.0 }
 0x591   :  { %560 = vadd.xlane.f32.xlu0 %v559_v23 }
 0x5fc   :  { %v558_v48 = vpop.xlane.xlu2 %557 }
 0x5fd   :  { %v562_v49 = vmul.f32 %v558_v48, %v932_v21 }
 0x5ff   :  { %v564_v50 = vadd.f32 1e-05, %v562_v49 }
 0x601   :  { %678 = vrsqrt.f32 %v564_v50  ;;  %vm572_vm10 = vweird.f32 %v564_v50 }
 0x604   :  { %v561_v51 = vpop.xlane.xlu0 %560 }
 0x605   :  { %v563_v52 = vmul.f32 %v561_v51, %v932_v21 }
 0x607   :  { %v679_v53 = vpop.eup %678  ;;  %v565_v26 = vadd.f32 1e-05, %v563_v52 }
 0x608   :  { %v567_v27 = vmul.f32 %v679_v53, %v564_v50  ;;  %vm573_vm9 = vweird.f32 %v679_v53 }
 0x609   :  { %680 = vrsqrt.f32 %v565_v26  ;;  %vm574_vm11 = vmor %vm572_vm10, %vm573_vm9  ;;  %vm582_vm13 = vweird.f32 %v565_v26 }
 0x60a   :  { %v568_v28 = vmul.f32 %v679_v53, %v567_v27 }
 0x60c   :  { %v569_v29 = vmul.f32 0.5, %v568_v28 }
 0x60e   :  { %v570_v31 = vsub.f32 1.5, %v569_v29 }
 0x60f   :  { %v681_v32 = vpop.eup %680 }
 0x610   :  { %v571_v33 = vmul.f32 %v679_v53, %v570_v31  ;;  %v577_v34 = vmul.f32 %v681_v32, %v565_v26  ;;  %vm583_vm12 = vweird.f32 %v681_v32 }
 0x611   :  { %vm584_vm14 = vmor %vm582_vm13, %vm583_vm12 }
 0x612   :  { %v575_v37 = vsel %vm574_vm11, %v679_v53, %v571_v33  ;;  %v578_v54 = vmul.f32 %v681_v32, %v577_v34 }
 0x613   :  { %v586_v38 = vmul.f32 %v575_v37, %v552_v30 }
 0x614   :  { %v579_v55 = vmul.f32 0.5, %v578_v54 }
 0x615   :  { %v589_v21 = vmul.f32 %v662_v36, %v586_v38 }
 0x616   :  { %v580_v41 = vsub.f32 1.5, %v579_v55 }
 0x617   :  { %v592_v56 = vadd.f32 %v663_v39, %v589_v21 }
 0x618   :  { %v581_v42 = vmul.f32 %v681_v32, %v580_v41 }
 0x619   :  { %594 = vst.msk [vmem:[#allocation5] sm:$0xff] %vm103_vm0, %v592_v56 }
 0x61a   :  { %v585_v57 = vsel %vm584_vm14, %v681_v32, %v581_v42 }
 0x61b   :  { %v587_v58 = vmul.f32 %v585_v57, %v553_v46 }
 0x61d   :  { %v590_v43 = vmul.f32 %v662_v36, %v587_v58 }
 0x61f   :  { %v593_v45 = vadd.f32 %v663_v39, %v590_v43 }
 0x621   :  { %595 = vst.msk [vmem:[#allocation5 + $0x8] sm:$0xff] %vm103_vm0, %v593_v45 }
 0x622   :  { %608 = dma.vmem_to_hbm [thread:$0]  %s601_s11, 256, %s603_s16, [#allocation4], %s735_s14, %s735_s14, %s736_s15  }
 0x623   :  { %732 = dma.done.wait [#allocation4], 256  }
 0x624   :  { %733 = vsyncadd [#allocation4], 4294967040 }
 0x625   :  { %613 = vsyncpa [#allocation3], 1 }
 0x626   :  { %614 = vsyncpa [#allocation4], 1 }

</bundles_post_ra>
